<compile_context>
chip_gen: v7x
topology: tpu7x:2x2x1
jax: 0.10.0
libtpu: 0.0.40
codegen_flags: <defaults>
</compile_context>

<pallas_src>
import functools

import jax
import jax.numpy as jnp
from jax.experimental import pallas as pl
from jax.experimental.pallas import tpu as pltpu


def _round_up(x: int, m: int) -> int:
    return ((x + m - 1) // m) * m


def _patch_embed_kernel(p_ref, w_ref, b_ref, o_ref):
    """One output slab: o = patches_tile @ weight + bias.

    p_ref: (tm, K)     bf16 patch rows (one tile of M)
    w_ref: (K, E_pad)  bf16 weight, NN layout, resident across the whole grid
    b_ref: (1, E_pad)  f32 bias, resident
    o_ref: (tm, E_pad) output in the caller's dtype
    """
    acc = jnp.dot(p_ref[...], w_ref[...], preferred_element_type=jnp.float32)
    o_ref[...] = (acc + b_ref[...]).astype(o_ref.dtype)


def _matmul_bias(patches, w_ke, bias2d, *, tm, out_dtype):
    """patches (M_pad, K) bf16, w_ke (K, E_pad) bf16, bias2d (1, E_pad) f32
    -> (M_pad, E_pad) out_dtype."""
    M_pad, K = patches.shape
    E_pad = w_ke.shape[1]
    assert M_pad % tm == 0

    # Honest traffic hint: patches streamed once, weight/bias read once,
    # output written once.
    cost = pl.CostEstimate(
        flops=2 * M_pad * K * E_pad,
        transcendentals=0,
        bytes_accessed=(
            patches.size * patches.dtype.itemsize
            + w_ke.size * w_ke.dtype.itemsize
            + bias2d.size * bias2d.dtype.itemsize
            + M_pad * E_pad * jnp.dtype(out_dtype).itemsize
        ),
    )

    return pl.pallas_call(
        _patch_embed_kernel,
        out_shape=jax.ShapeDtypeStruct((M_pad, E_pad), out_dtype),
        grid_spec=pltpu.PrefetchScalarGridSpec(
            num_scalar_prefetch=0,
            grid=(M_pad // tm,),
            in_specs=[
                pl.BlockSpec((tm, K), lambda i: (i, 0)),        # streamed patches
                pl.BlockSpec((K, E_pad), lambda i: (0, 0)),     # resident weight
                pl.BlockSpec((1, E_pad), lambda i: (0, 0)),     # resident bias
            ],
            out_specs=pl.BlockSpec((tm, E_pad), lambda i: (i, 0)),
        ),
        compiler_params=pltpu.CompilerParams(
            dimension_semantics=("parallel",),
        ),
        cost_estimate=cost,
    )(patches, w_ke, bias2d)


@functools.partial(jax.jit, static_argnames=("patch_size",))
def patch_embedding_forward(x, conv_weight, conv_bias, *, patch_size):
    """x: (B, C, H, W); conv_weight: (E, C, P, P); conv_bias: (E,) -> (B, N, E)."""
    B, C, H, W = x.shape
    P = patch_size
    assert H % P == 0 and W % P == 0, (
        f"Input image size must be divisible by patch size: {(H, W)} vs {P}"
    )
    E = conv_weight.shape[0]
    nH, nW = H // P, W // P
    N = nH * nW
    K = C * P * P
    M = B * N

    # Patch extraction (glue): cast to bf16 FIRST so the transpose moves half
    # the bytes, then (B,C,H,W) -> (B*N, C*P*P) with each row flattened in
    # (c, ph, pw) order to match the PyTorch OIHW conv-weight layout.
    # TODO(synk): fuse this transpose into the kernel's input DMA
    # (allow_input_fusion / manual gather from an ANY-space x ref) so it stops
    # being a standalone HBM round trip at real ViT scale.
    x_bf = x.astype(jnp.bfloat16)
    patches = x_bf.reshape(B, C, nH, P, nW, P)
    patches = patches.transpose(0, 2, 4, 1, 3, 5).reshape(M, K)

    # Weight transposed once to NN layout (K, E): the MXU contracts the LHS last
    # dim against the RHS first dim with no per-step relayout.
    w_ke = conv_weight.astype(jnp.bfloat16).reshape(E, K).T
    bias_f32 = conv_bias.astype(jnp.float32)

    # Tile selection: weight is resident, so only M is tiled. Large tm amortizes
    # the per-step pipeline overhead; bf16 sublane packing -> multiples of 16.
    tm = min(512, _round_up(M, 16))
    M_pad = _round_up(M, tm)
    E_pad = _round_up(E, 128)

    if M_pad != M:
        patches = jnp.pad(patches, ((0, M_pad - M), (0, 0)))
    if E_pad != E:
        w_ke = jnp.pad(w_ke, ((0, 0), (0, E_pad - E)))
        bias_f32 = jnp.pad(bias_f32, ((0, E_pad - E),))
    bias2d = bias_f32.reshape(1, E_pad)

    # Output comes out of the kernel already in x.dtype (f32 accumulation inside);
    # no separate cast pass, and no slice pass unless padding was needed.
    out = _matmul_bias(patches, w_ke, bias2d, tm=tm, out_dtype=x.dtype)
    if M_pad != M or E_pad != E:
        out = out[:M, :E]
    return out.reshape(B, N, E)  # == flatten(2,3) + permute(0,2,1)


def reference_forward(x, conv_weight, conv_bias, *, patch_size):
    """Plain-JAX reference matching the PyTorch module (f32 conv)."""
    y = jax.lax.conv_general_dilated(
        x, conv_weight,
        window_strides=(patch_size, patch_size),
        padding="VALID",
        dimension_numbers=("NCHW", "OIHW", "NCHW"),
    ) + conv_bias[None, :, None, None]
    B, E, h, w = y.shape
    return y.reshape(B, E, h * w).transpose(0, 2, 1)


if __name__ == "__main__":
    # Small shapes consistent with the module: B=2, C=4, H=W=16, P=8, E=128.
    B, C, H, W = 2, 4, 16, 16
    P, E = 8, 128

    key = jax.random.PRNGKey(0)
    kx, kw, kb = jax.random.split(key, 3)
    x = jax.random.normal(kx, (B, C, H, W), dtype=jnp.float32)
    # Deterministic parameter init (synthetic; no checkpoint load).
    fan_in = C * P * P
    conv_weight = jax.random.normal(kw, (E, C, P, P), dtype=jnp.float32) / jnp.sqrt(fan_in)
    conv_bias = jax.random.normal(kb, (E,), dtype=jnp.float32) * 0.01

    out = patch_embedding_forward(x, conv_weight, conv_bias, patch_size=P)
    out = jax.block_until_ready(out)

    ref = reference_forward(x, conv_weight, conv_bias, patch_size=P)
    assert out.shape == (B, (H // P) * (W // P), E), out.shape
    # Tolerance accounts for bf16 matmul inputs (f32 accumulation).
    assert jnp.allclose(out, ref, atol=5e-2, rtol=5e-2), float(jnp.max(jnp.abs(out - ref)))

    print("KERNEL_OK")
</pallas_src>

<mosaic_0001>
module attributes {stable_mosaic.version = 11 : i64} {
  func.func @_patch_embed_kernel(%arg0: i32, %arg1: memref<16x256xbf16, #tpu.memory_space<vmem>>, %arg2: memref<256x128xbf16, #tpu.memory_space<vmem>>, %arg3: memref<1x128xf32, #tpu.memory_space<vmem>>, %arg4: memref<16x128xf32, #tpu.memory_space<vmem>>) attributes {dimension_semantics = [#tpu.dimension_semantics<parallel>], iteration_bounds = array<i64: 1>, scalar_prefetch = 0 : i64, scratch_operands = 0 : i64, tpu.core_type = #tpu.core_type<tc>, window_params = [{transform_indices = @transform_0, window_bounds = array<i64: 16, 256>}, {pipeline_mode = #tpu.pipeline_mode<synchronous>, transform_indices = @transform_1, window_bounds = array<i64: 256, 128>}, {pipeline_mode = #tpu.pipeline_mode<synchronous>, transform_indices = @transform_2, window_bounds = array<i64: 1, 128>}, {transform_indices = @transform_3, window_bounds = array<i64: 16, 128>}]} {
    %c0 = arith.constant 0 : index
    %c0_0 = arith.constant 0 : index
    %0 = vector.load %arg1[%c0, %c0_0] : memref<16x256xbf16, #tpu.memory_space<vmem>>, vector<16x256xbf16>
    %c0_1 = arith.constant 0 : index
    %c0_2 = arith.constant 0 : index
    %1 = vector.load %arg2[%c0_1, %c0_2] : memref<256x128xbf16, #tpu.memory_space<vmem>>, vector<256x128xbf16>
    %cst = arith.constant dense<0.000000e+00> : vector<16x128xf32>
    %2 = tpu.matmul %0, %1, %cst {dimension_numbers = #tpu.dot_dimension_numbers<[1], [0], [0], [1], [0, 0, 1, 1], [], []>} : vector<16x256xbf16>, vector<256x128xbf16>, vector<16x128xf32> -> vector<16x128xf32>
    %c0_3 = arith.constant 0 : index
    %c0_4 = arith.constant 0 : index
    %3 = vector.load %arg3[%c0_3, %c0_4] : memref<1x128xf32, #tpu.memory_space<vmem>>, vector<1x128xf32>
    %4 = vector.broadcast %3 : vector<1x128xf32> to vector<16x128xf32>
    %5 = arith.addf %2, %4 : vector<16x128xf32>
    %c0_5 = arith.constant 0 : index
    %c0_6 = arith.constant 0 : index
    %6 = vector.load %arg4[%c0_5, %c0_6] : memref<16x128xf32, #tpu.memory_space<vmem>>, vector<16x128xf32>
    tpu.vector_store %arg4[%c0_5, %c0_6], %5 {strides = array<i32>} : memref<16x128xf32, #tpu.memory_space<vmem>>, vector<16x128xf32>,
    return
  }
  func.func @transform_0(%arg0: i32) -> (i32, i32) {
    %c0_i32 = arith.constant 0 : i32
    %c0_i32_0 = arith.constant 0 : i32
    return %arg0, %c0_i32 : i32, i32
  }
  func.func @transform_1(%arg0: i32) -> (i32, i32) {
    %c0_i32 = arith.constant 0 : i32
    %c0_i32_0 = arith.constant 0 : i32
    %c0_i32_1 = arith.constant 0 : i32
    return %c0_i32, %c0_i32_0 : i32, i32
  }
  func.func @transform_2(%arg0: i32) -> (i32, i32) {
    %c0_i32 = arith.constant 0 : i32
    %c0_i32_0 = arith.constant 0 : i32
    %c0_i32_1 = arith.constant 0 : i32
    return %c0_i32, %c0_i32_0 : i32, i32
  }
  func.func @transform_3(%arg0: i32) -> (i32, i32) {
    %c0_i32 = arith.constant 0 : i32
    %c0_i32_0 = arith.constant 0 : i32
    return %arg0, %c0_i32 : i32, i32
  }
}

</mosaic_0001>

<bundles_post_ra>
// kernel: patch_embedding_forward.1
= control target key start
LH: loop header
LB: loop body
LE: loop exit
PB: predicated region body
PF: predicated region fallthrough
CT: control target
= control target key end

     0   :  { %s352_s1 = inlined_call_operand.vmem [shape: bf16[256,128], index: 1, kind: input, shape index: {}]   ;;  %s353_s0 = inlined_call_operand.vmem [shape: bf16[16,256], index: 0, kind: input, shape index: {}]   ;;  %s354_s2 = inlined_call_operand.vmem [shape: f32[1,128], index: 2, kind: input, shape index: {}]   ;;  %s355_s3 = inlined_call_operand.vmem [shape: f32[16,128], index: 3, kind: output, shape index: {}]  }
   0x1   :  { %v250_v0 = vld [vmem:[%s352_s1 + $0x40] sm:$0xff]   ;;  %v252_v2 = vld [vmem:[%s352_s1 + $0x48] sm:$0xff]   ;;  %v254_v4 = vld [vmem:[%s352_s1 + $0x50] sm:$0xff]  }
   0x2   :  { %v251_v1 = vld [vmem:[%s352_s1] sm:$0xff]   ;;  %228 = vmatprep.subr.bf16.mxu0 %v250_v0  ;;  %v253_v3 = vld [vmem:[%s352_s1 + $0x8] sm:$0xff]   ;;  %v255_v5 = vld [vmem:[%s352_s1 + $0x10] sm:$0xff]  }
   0x3   :  { %229 = vmatpush3.bf16.msra.mxu0 %v251_v1  ;;  %v256_v6 = vld [vmem:[%s352_s1 + $0x58] sm:$0xff]   ;;  %v258_v8 = vld [vmem:[%s352_s1 + $0x60] sm:$0xff]   ;;  %v260_v10 = vld [vmem:[%s352_s1 + $0x68] sm:$0xff]  }
   0x4   :  { %230 = vmatprep.subr.bf16.mxu0 %v252_v2  ;;  %v257_v7 = vld [vmem:[%s352_s1 + $0x18] sm:$0xff]   ;;  %v259_v9 = vld [vmem:[%s352_s1 + $0x20] sm:$0xff]   ;;  %v261_v12 = vld [vmem:[%s352_s1 + $0x28] sm:$0xff]  }
   0x5   :  { %v268_v11 = vld [vmem:[%s353_s0 + $0x4] ss:$8 sps:$4 sm:$0xff]   ;;  %v262_v13 = vld [vmem:[%s352_s1 + $0x70] sm:$0xff]   ;;  %v264_v15 = vld [vmem:[%s352_s1 + $0x78] sm:$0xff]  }
   0x6   :  { %194 = vmatprep.mubr.bf16.mxu0 %v268_v11  ;;  %v263_v14 = vld [vmem:[%s352_s1 + $0x30] sm:$0xff]   ;;  %v265_v16 = vld [vmem:[%s352_s1 + $0x38] sm:$0xff]   ;;  %v266_v17 = vld [vmem:[%s353_s0] ss:$8 sps:$4 sm:$0xff]  }
   0x7   :  { %231 = vmatpush3.bf16.msra.mxu0 %v253_v3  ;;  %v209_v19 = vld [vmem:[%s354_s2] ss:$0 sm:$0xff] }
   0x8   :  { %232 = vmatprep.subr.bf16.mxu0 %v254_v4 }
   0xb   :  { %233 = vmatpush3.bf16.msra.mxu0 %v255_v5 }
   0xc   :  { %234 = vmatprep.subr.bf16.mxu0 %v256_v6 }
   0xf   :  { %235 = vmatpush3.bf16.msra.mxu0 %v257_v7 }
  0x10   :  { %236 = vmatprep.subr.bf16.mxu0 %v258_v8 }
  0x13   :  { %237 = vmatpush3.bf16.msra.mxu0 %v259_v9 }
  0x14   :  { %238 = vmatprep.subr.bf16.mxu0 %v260_v10 }
  0x17   :  { %239 = vmatpush3.bf16.msra.mxu0 %v261_v12 }
  0x18   :  { %240 = vmatprep.subr.bf16.mxu0 %v262_v13 }
  0x1b   :  { %241 = vmatpush3.bf16.msra.mxu0 %v263_v14 }
  0x1c   :  { %242 = vmatprep.subr.bf16.mxu0 %v264_v15 }
  0x1f   :  { %243 = vmatpush3.bf16.msra.mxu0 %v265_v16 }
  0x22   :  { %195 = vmatmul.mubr.bf16.vlgmr.msra.gmra.mrb[0].mxu0 %v266_v17 }
  0xf5   :  { %v244_v18 = vpop.f32.mrb[0].mxu0 }
  0xf6   :  { %v245_v20 = vpop.f32.mrb[1].mxu0 }
  0xf7   :  { %v246_v21 = vadd.f32 %v245_v20, %v244_v18  ;;  %v247_v22 = vpop.f32.mrb[2].mxu0 }
  0xf8   :  { %v248_v23 = vpop.f32.mrb[3].mxu0 }
  0xf9   :  { %v197_v24 = vadd.f32 %v246_v21, %v209_v19  ;;  %v249_v25 = vadd.f32 %v248_v23, %v247_v22 }
  0xfb   :  { %203 = vst [vmem:[%s355_s3] sm:$0xff] %v197_v24  ;;  %v200_v26 = vadd.f32 %v249_v25, %v209_v19 }
  0xfd   :  { %204 = vst [vmem:[%s355_s3 + $0x8] sm:$0xff] %v200_v26 }

</bundles_post_ra>
